<compile_context>
chip_gen: v6e
topology: v6e:2x2x1
jax: 0.10.0
libtpu: 0.0.40
codegen_flags: <defaults>
</compile_context>

<pallas_src>
from typing import NamedTuple, Optional

import jax
import jax.numpy as jnp
from jax.experimental import pallas as pl
from jax.experimental.pallas import tpu as pltpu


class EmbedReturn(NamedTuple):
    emb: Optional[jnp.ndarray] = None
    time_emb: Optional[jnp.ndarray] = None
    style: Optional[jnp.ndarray] = None


# ---------------------------------------------------------------------------
# Kernel body: fused  x @ W1 + b1 -> SiLU -> @ W2 + b2
# W1/W2 arrive pre-cast to bf16 (hoisted out of the kernel); biases are f32.
# ---------------------------------------------------------------------------
def _time_embed_kernel(t_ref, w1_ref, b1_ref, w2_ref, b2_ref, o_ref):
    t = t_ref[...].astype(jnp.bfloat16)                # no-op if input is bf16
    h = jnp.dot(t, w1_ref[...], preferred_element_type=jnp.float32)
    h = h + b1_ref[...]                                # (1, Co) broadcast, f32
    h = h * jax.nn.sigmoid(h)                          # SiLU in f32 (VPU/EUP)
    out = jnp.dot(h.astype(jnp.bfloat16), w2_ref[...],
                  preferred_element_type=jnp.float32)
    out = out + b2_ref[...]
    o_ref[...] = out.astype(o_ref.dtype)


_DEFAULT_TILE = 1024      # amortizes the ~0.35 us per-grid-step overhead
_VMEM_BUDGET = 12 << 20   # stays under v5e's 16 MiB default scoped VMEM


def time_embed_pallas(time_emb, w1, b1, w2, b2, *, batch_tile=None,
                      out_dtype=None):
    """Fused Linear -> SiLU -> Linear.

    time_emb: [B, Ct]; w1: [Ct, Co]; w2: [Co, Co]; b1, b2: [Co].
    Output dtype follows the input dtype unless out_dtype is given.
    """
    B, Ct = time_emb.shape
    Co = w1.shape[1]
    out_dtype = jnp.dtype(out_dtype or time_emb.dtype)
    in_itemsize = time_emb.dtype.itemsize
    out_itemsize = out_dtype.itemsize

    # One-time hoisted casts: bf16 weights halve DMA + resident VMEM and avoid
    # re-casting the grid-invariant blocks on the VPU every grid step.
    w1b = w1.astype(jnp.bfloat16)
    w2b = w2.astype(jnp.bfloat16)
    b1f = b1.astype(jnp.float32).reshape(1, Co)
    b2f = b2.astype(jnp.float32).reshape(1, Co)

    weight_bytes = (Ct * Co + Co * Co) * 2 + 2 * Co * 4   # bf16 W, f32 b

    def act_bytes(rows):
        return rows * (Ct * in_itemsize + Co * out_itemsize)

    cost = pl.CostEstimate(
        flops=2 * B * Ct * Co + 2 * B * Co * Co,
        transcendentals=B * Co,
        bytes_accessed=act_bytes(B) + weight_bytes,
    )

    # ---- path selection by VMEM footprint (not a hard B cutoff) -----------
    if batch_tile is None:
        gridless_fits = weight_bytes + act_bytes(B) <= _VMEM_BUDGET
        if B < 2 * _DEFAULT_TILE and gridless_fits:
            batch_tile = B                       # gridless, no pipeline at all
        else:
            tb = _DEFAULT_TILE
            # 2x double-buffered activation tiles + (conservatively) 2x the
            # resident weight buffers must fit the scoped-VMEM budget.
            while tb > 16 and 2 * act_bytes(tb) + 2 * weight_bytes > _VMEM_BUDGET:
                tb //= 2
            batch_tile = max(16, tb)

    if batch_tile >= B:
        # --- gridless path: whole problem resident in VMEM -----------------
        vmem = pl.BlockSpec(memory_space=pltpu.MemorySpace.VMEM)
        return pl.pallas_call(
            _time_embed_kernel,
            out_shape=jax.ShapeDtypeStruct((B, Co), out_dtype),
            in_specs=[vmem, vmem, vmem, vmem, vmem],
            out_specs=vmem,
            cost_estimate=cost,
        )(time_emb, w1b, b1f, w2b, b2f)

    # --- batch-tiled path: weights resident, batch axis pipelined ----------
    TB = batch_tile
    assert TB % 16 == 0, "batch tile must be a multiple of 16 (bf16 sublanes)"
    n_tiles = pl.cdiv(B, TB)
    Bp = n_tiles * TB
    # Padded tail rows pass through bias+SiLU but are sliced off below; never
    # switch this path to accumulating into the output in place.
    x = time_emb if Bp == B else jnp.pad(time_emb, ((0, Bp - B), (0, 0)))

    # TODO(synk): single-buffer the grid-invariant weight blocks
    # (pipeline_mode=pl.Buffered(1)) once validated on all gens; bf16 weights
    # already keep the extra buffer small even at Co ~ 2048.
    out = pl.pallas_call(
        _time_embed_kernel,
        out_shape=jax.ShapeDtypeStruct((Bp, Co), out_dtype),
        grid_spec=pltpu.PrefetchScalarGridSpec(
            num_scalar_prefetch=0,
            grid=(n_tiles,),
            in_specs=[
                pl.BlockSpec((TB, Ct), lambda i: (i, 0)),   # batch tile
                pl.BlockSpec((Ct, Co), lambda i: (0, 0)),   # W1 resident (bf16)
                pl.BlockSpec((1, Co), lambda i: (0, 0)),    # b1 resident (f32)
                pl.BlockSpec((Co, Co), lambda i: (0, 0)),   # W2 resident (bf16)
                pl.BlockSpec((1, Co), lambda i: (0, 0)),    # b2 resident (f32)
            ],
            out_specs=pl.BlockSpec((TB, Co), lambda i: (i, 0)),
        ),
        compiler_params=pltpu.CompilerParams(
            dimension_semantics=("parallel",),   # megacore sharding on v7x
            vmem_limit_bytes=32 << 20,
        ),
        cost_estimate=cost,
    )(x, w1b, b1f, w2b, b2f)
    return out[:B] if Bp != B else out


def time_style_seperate_embed_forward(params, time_emb=None, cond=None,
                                      batch_tile=None, out_dtype=None):
    """Forward pass matching TimeStyleSeperateEmbed.forward."""
    if time_emb is not None:
        time_emb = time_embed_pallas(
            time_emb,
            params["w1"], params["b1"],
            params["w2"], params["b2"],
            batch_tile=batch_tile,
            out_dtype=out_dtype,
        )
    style = cond  # nn.Identity — pure passthrough, no kernel needed.
    return EmbedReturn(emb=style, time_emb=time_emb, style=style)


def init_params(key, time_channels, time_out_channels, dtype=jnp.float32):
    k1, k2, k3, k4 = jax.random.split(key, 4)
    # Deterministic synthetic init (roughly PyTorch default-linear scale).
    s1 = 1.0 / jnp.sqrt(time_channels)
    s2 = 1.0 / jnp.sqrt(time_out_channels)
    return {
        "w1": (jax.random.uniform(k1, (time_channels, time_out_channels),
                                  dtype, -1.0, 1.0) * s1),
        "b1": (jax.random.uniform(k2, (time_out_channels,),
                                  dtype, -1.0, 1.0) * s1),
        "w2": (jax.random.uniform(k3, (time_out_channels, time_out_channels),
                                  dtype, -1.0, 1.0) * s2),
        "b2": (jax.random.uniform(k4, (time_out_channels,),
                                  dtype, -1.0, 1.0) * s2),
    }


def _ref_bf16(time_emb, p):
    """Pure-JAX reference with the same bf16-operand / f32-accumulate recipe."""
    h = jnp.dot(time_emb.astype(jnp.bfloat16), p["w1"].astype(jnp.bfloat16),
                preferred_element_type=jnp.float32) + p["b1"].astype(jnp.float32)
    h = h * jax.nn.sigmoid(h)
    out = jnp.dot(h.astype(jnp.bfloat16), p["w2"].astype(jnp.bfloat16),
                  preferred_element_type=jnp.float32) + p["b2"].astype(jnp.float32)
    return out


def _ref_f32(time_emb, p):
    h = time_emb @ p["w1"] + p["b1"]
    h = h * jax.nn.sigmoid(h)
    return h @ p["w2"] + p["b2"]


if __name__ == "__main__":
    key = jax.random.PRNGKey(0)
    k_params, k_time, k_cond, k_time2 = jax.random.split(key, 4)

    time_channels = 128       # input time-embedding dim
    time_out_channels = 128   # output time-embedding dim
    style_dim = 128           # cond / style vector dim

    params = init_params(k_params, time_channels, time_out_channels)

    # --- small batch, f32 activations: gridless VMEM-resident path ----------
    B = 8
    time_emb = jax.random.normal(k_time, (B, time_channels), jnp.float32)
    cond = jax.random.normal(k_cond, (B, style_dim), jnp.float32)

    out = time_style_seperate_embed_forward(params, time_emb=time_emb, cond=cond)
    jax.block_until_ready(out.time_emb)
    jax.block_until_ready(out.style)

    assert out.time_emb.shape == (B, time_out_channels)
    assert out.time_emb.dtype == jnp.float32
    ref_b = _ref_bf16(time_emb, params)
    ref_f = _ref_f32(time_emb, params)
    assert jnp.allclose(out.time_emb, ref_b, atol=2e-3, rtol=2e-3)
    assert jnp.allclose(out.time_emb, ref_f, atol=5e-2, rtol=5e-2)
    assert out.emb is out.style and jnp.array_equal(out.style, cond)

    # --- larger batch, bf16 activations: batch-tiled pipelined path ---------
    B2, TB = 32, 16
    time_emb2 = jax.random.normal(k_time2, (B2, time_channels),
                                  jnp.float32).astype(jnp.bfloat16)
    out2 = time_style_seperate_embed_forward(params, time_emb=time_emb2,
                                             cond=None, batch_tile=TB)
    jax.block_until_ready(out2.time_emb)

    assert out2.time_emb.shape == (B2, time_out_channels)
    assert out2.time_emb.dtype == jnp.bfloat16
    ref2 = _ref_bf16(time_emb2.astype(jnp.float32), params)
    assert jnp.allclose(out2.time_emb.astype(jnp.float32), ref2,
                        atol=3e-2, rtol=3e-2)
    assert out2.emb is None and out2.style is None

    print("KERNEL_OK")
</pallas_src>

<mosaic_0001>
module attributes {stable_mosaic.version = 11 : i64} {
  func.func @_time_embed_kernel(%arg0: memref<8x128xf32, #tpu.memory_space<vmem>>, %arg1: memref<128x128xbf16, #tpu.memory_space<vmem>>, %arg2: memref<1x128xf32, #tpu.memory_space<vmem>>, %arg3: memref<128x128xbf16, #tpu.memory_space<vmem>>, %arg4: memref<1x128xf32, #tpu.memory_space<vmem>>, %arg5: memref<8x128xf32, #tpu.memory_space<vmem>>) attributes {dimension_semantics = [], scalar_prefetch = 0 : i64, scratch_operands = 0 : i64, tpu.core_type = #tpu.core_type<tc>} {
    %c0 = arith.constant 0 : index
    %c0_0 = arith.constant 0 : index
    %0 = vector.load %arg0[%c0, %c0_0] : memref<8x128xf32, #tpu.memory_space<vmem>>, vector<8x128xf32>
    %1 = arith.truncf %0 : vector<8x128xf32> to vector<8x128xbf16>
    %c0_1 = arith.constant 0 : index
    %c0_2 = arith.constant 0 : index
    %2 = vector.load %arg1[%c0_1, %c0_2] : memref<128x128xbf16, #tpu.memory_space<vmem>>, vector<128x128xbf16>
    %cst = arith.constant dense<0.000000e+00> : vector<8x128xf32>
    %3 = tpu.matmul %1, %2, %cst {dimension_numbers = #tpu.dot_dimension_numbers<[1], [0], [0], [1], [0, 0, 1, 1], [], []>} : vector<8x128xbf16>, vector<128x128xbf16>, vector<8x128xf32> -> vector<8x128xf32>
    %c0_3 = arith.constant 0 : index
    %c0_4 = arith.constant 0 : index
    %4 = vector.load %arg2[%c0_3, %c0_4] : memref<1x128xf32, #tpu.memory_space<vmem>>, vector<1x128xf32>
    %5 = vector.broadcast %4 : vector<1x128xf32> to vector<8x128xf32>
    %6 = arith.addf %3, %5 : vector<8x128xf32>
    %7 = arith.negf %6 : vector<8x128xf32>
    %8 = math.exp %7 : vector<8x128xf32>
    %cst_5 = arith.constant 1.000000e+00 : f32
    %9 = vector.broadcast %cst_5 : f32 to vector<8x128xf32>
    %10 = arith.addf %9, %8 : vector<8x128xf32>
    %11 = arith.divf %9, %10 : vector<8x128xf32>
    %12 = arith.mulf %6, %11 : vector<8x128xf32>
    %13 = arith.truncf %12 : vector<8x128xf32> to vector<8x128xbf16>
    %c0_6 = arith.constant 0 : index
    %c0_7 = arith.constant 0 : index
    %14 = vector.load %arg3[%c0_6, %c0_7] : memref<128x128xbf16, #tpu.memory_space<vmem>>, vector<128x128xbf16>
    %cst_8 = arith.constant dense<0.000000e+00> : vector<8x128xf32>
    %15 = tpu.matmul %13, %14, %cst_8 {dimension_numbers = #tpu.dot_dimension_numbers<[1], [0], [0], [1], [0, 0, 1, 1], [], []>} : vector<8x128xbf16>, vector<128x128xbf16>, vector<8x128xf32> -> vector<8x128xf32>
    %c0_9 = arith.constant 0 : index
    %c0_10 = arith.constant 0 : index
    %16 = vector.load %arg4[%c0_9, %c0_10] : memref<1x128xf32, #tpu.memory_space<vmem>>, vector<1x128xf32>
    %17 = vector.broadcast %16 : vector<1x128xf32> to vector<8x128xf32>
    %18 = arith.addf %15, %17 : vector<8x128xf32>
    %c0_11 = arith.constant 0 : index
    %c0_12 = arith.constant 0 : index
    %19 = vector.load %arg5[%c0_11, %c0_12] : memref<8x128xf32, #tpu.memory_space<vmem>>, vector<8x128xf32>
    tpu.vector_store %arg5[%c0_11, %c0_12], %18 {strides = array<i32>} : memref<8x128xf32, #tpu.memory_space<vmem>>, vector<8x128xf32>,
    return
  }
}

</mosaic_0001>

<bundles_post_ra>
// kernel: tpu_custom_call.1
= control target key start
LH: loop header
LB: loop body
LE: loop exit
PB: predicated region body
PF: predicated region fallthrough
CT: control target
= control target key end

     0   :  { %10 = vsyncpa [#allocation3], 0  ;;  %s557_s0 = inlined_call_operand.hbm [shape: f32[8,128], index: 0, kind: input, shape index: {}]   ;;  %s558_s1 = inlined_call_operand.hbm [shape: bf16[128,128], index: 1, kind: input, shape index: {}]   ;;  %s559_s2 = inlined_call_operand.vmem [shape: f32[1,128], index: 2, kind: input, shape index: {}]   ;;  %s560_s3 = inlined_call_operand.hbm [shape: bf16[128,128], index: 3, kind: input, shape index: {}]   ;;  %s561_s4 = inlined_call_operand.vmem [shape: f32[1,128], index: 4, kind: input, shape index: {}]   ;;  %s562_s5 = inlined_call_operand.hbm [shape: f32[8,128], index: 5, kind: output, shape index: {}]  }
   0x1   :  { %11 = vsyncpa [#allocation6], 0 }
   0x2   :  { %12 = vsyncpa [#allocation4], 0  ;;  %s501_s18 = smov [#allocation5]  }
   0x3   :  { %s28_s19 = sshll.u32 %s501_s18, 4  ;;  %s29_s19 = int_to_ptr.vmem [resolvable:$true] %s28_s19 }
   0x4   :  { %s423_s20 = scalar_lea.vmem %s29_s19, 1024  ;;  %p428_p1 = scmp.lt.s32.totalorder %s29_s19, %s29_s19 }
   0x5   :  { %p424_p0 = scmp.ne.s32.totalorder %s29_s19, %s423_s20  ;;  %p429_p2 = scmp.lt.s32.totalorder %s423_s20, %s423_s20 }
   0x7   :  { %p430_p3 = por %p429_p2, %p428_p1 }
   0x9   :  { %p431_p4 = pnand %p430_p3, %p424_p0 }
   0xb   :  { %434 = shalt.err (!%p431_p4)
}
   0xc   :  { %s502_s21 = smov 64   ;;  %s503_s22 = smov 4  }
   0xd   :  { %34 = dma.hbm_to_vmem [thread:$0]  %s558_s1, 1024, %s29_s19, [#allocation6], %s502_s21, %s502_s21, %s503_s22  }
   0xe   :  { %s504_s25 = smov [#allocation2]   ;;  %s505_s27 = smov [#allocation7]  }
   0xf   :  { %s19_s26 = sshll.u32 %s504_s25, 4  ;;  %s42_s28 = sshll.u32 %s505_s27, 4  ;;  %s20_s26 = int_to_ptr.vmem [resolvable:$true] %s19_s26  ;;  %s43_s28 = int_to_ptr.vmem [resolvable:$true] %s42_s28 }
  0x10   :  { %s443_s29 = scalar_lea.vmem %s20_s26, 128  ;;  %p448_p6 = scmp.lt.s32.totalorder %s20_s26, %s20_s26 }
  0x11   :  { %p444_p5 = scmp.ne.s32.totalorder %s20_s26, %s443_s29  ;;  %p449_p7 = scmp.lt.s32.totalorder %s443_s29, %s443_s29 }
  0x13   :  { %p450_p8 = por %p449_p7, %p448_p6 }
  0x15   :  { %p451_p9 = pnand %p450_p8, %p444_p5 }
  0x17   :  { %454 = shalt.err (!%p451_p9)
}
  0x18   :  { %22 = dma.hbm_to_vmem [thread:$0]  %s557_s0, 128, %s20_s26, [#allocation3]  }
  0x19   :  { %s463_s7 = scalar_lea.vmem %s43_s28, 1024  ;;  %p468_p11 = scmp.lt.s32.totalorder %s43_s28, %s43_s28 }
  0x1a   :  { %p464_p10 = scmp.ne.s32.totalorder %s43_s28, %s463_s7  ;;  %p469_p12 = scmp.lt.s32.totalorder %s463_s7, %s463_s7 }
  0x1c   :  { %p470_p13 = por %p469_p12, %p468_p11 }
  0x1e   :  { %p471_p0 = pnand %p470_p13, %p464_p10 }
  0x20   :  { %474 = shalt.err (!%p471_p0)
}
  0x21   :  { %48 = dma.hbm_to_vmem [thread:$0]  %s560_s3, 1024, %s43_s28, [#allocation6], %s502_s21, %s502_s21, %s503_s22  }
  0x22   :  { %495 = dma.done.wait [#allocation3], 128  }
  0x23   :  { %496 = vsyncadd [#allocation3], 4294967168 }
  0x24   :  { %497 = dma.done.wait [#allocation6], 2048  }
  0x25   :  { %498 = vsyncadd [#allocation6], 4294965248  ;;  %v506_v0 = vmov 0.0   ;;  %vm507_vm0 = vmmov 0   ;;  %v395_v1 = vld [vmem:[#allocation5 + $0x38] sm:$0xff]   ;;  %v396_v2 = vld [vmem:[#allocation5 + $0x30] sm:$0xff]  }
  0x26   :  { %347 = vmatprep.subr.bf16.mxu0 %v506_v0  ;;  %363 = vmatprep.mubr.msk.bf16.mxu0 %vm507_vm0, %v506_v0  ;;  %v397_v3 = vld [vmem:[#allocation5 + $0x28] sm:$0xff]   ;;  %v398_v4 = vld [vmem:[#allocation5 + $0x20] sm:$0xff]   ;;  %v399_v5 = vld [vmem:[#allocation5 + $0x18] sm:$0xff]   ;;  %s508_s11 = smov [#allocation8]  }
  0x27   :  { %367 = vmatprep.subr.bf16.mxu1 %v506_v0  ;;  %383 = vmatprep.mubr.msk.bf16.mxu1 %vm507_vm0, %v506_v0  ;;  %v400_v6 = vld [vmem:[#allocation5 + $0x10] sm:$0xff]   ;;  %v401_v7 = vld [vmem:[#allocation5 + $0x8] sm:$0xff]   ;;  %v402_v8 = vld [vmem:[#allocation5] sm:$0xff]  }
  0x28   :  { %348 = vmatpush3.bf16.msra.mxu0 %v395_v1  ;;  %v61_v9 = vld [vmem:[#allocation2] sm:$0xff]  ;;  %v404_v12 = vld [vmem:[#allocation7 + $0x30] sm:$0xff]   ;;  %v405_v13 = vld [vmem:[#allocation7 + $0x28] sm:$0xff]  }
  0x29   :  { %349 = vmatprep.subr.bf16.mxu0 %v506_v0  ;;  %v62_v10 = vpack.c.bf16 %v61_v9, %v61_v9  ;;  %v403_v11 = vld [vmem:[#allocation7 + $0x38] sm:$0xff]   ;;  %v406_v14 = vld [vmem:[#allocation7 + $0x20] sm:$0xff]   ;;  %v408_v16 = vld [vmem:[#allocation7 + $0x10] sm:$0xff]  }
  0x2a   :  { %368 = vmatpush3.bf16.msra.mxu1 %v403_v11  ;;  %v407_v15 = vld [vmem:[#allocation7 + $0x18] sm:$0xff]   ;;  %v409_v17 = vld [vmem:[#allocation7 + $0x8] sm:$0xff]   ;;  %v410_v18 = vld [vmem:[#allocation7] sm:$0xff]  }
  0x2b   :  { %369 = vmatprep.subr.bf16.mxu1 %v506_v0  ;;  %v310_v19 = vld [vmem:[%s559_s2] ss:$0 sm:$0xff]  ;;  %s300_s2 = sshll.u32 %s508_s11, 4  ;;  %s301_s2 = int_to_ptr.vmem [resolvable:$true] %s300_s2 }
  0x2c   :  { %350 = vmatpush3.bf16.msra.mxu0 %v396_v2  ;;  %v320_v31 = vld [vmem:[%s561_s4] ss:$0 sm:$0xff]  ;;  %s475_s12 = scalar_lea.vmem %s301_s2, 128  ;;  %p480_p2 = scmp.lt.s32.totalorder %s301_s2, %s301_s2 }
  0x2d   :  { %351 = vmatprep.subr.bf16.mxu0 %v506_v0  ;;  %p476_p1 = scmp.ne.s32.totalorder %s301_s2, %s475_s12  ;;  %p481_p3 = scmp.lt.s32.totalorder %s475_s12, %s475_s12 }
  0x2e   :  { %370 = vmatpush3.bf16.msra.mxu1 %v404_v12 }
  0x2f   :  { %371 = vmatprep.subr.bf16.mxu1 %v506_v0  ;;  %p482_p4 = por %p481_p3, %p480_p2 }
  0x30   :  { %352 = vmatpush3.bf16.msra.mxu0 %v397_v3 }
  0x31   :  { %353 = vmatprep.subr.bf16.mxu0 %v506_v0  ;;  %p483_p5 = pnand %p482_p4, %p476_p1 }
  0x32   :  { %372 = vmatpush3.bf16.msra.mxu1 %v405_v13 }
  0x33   :  { %373 = vmatprep.subr.bf16.mxu1 %v506_v0 }
  0x34   :  { %354 = vmatpush3.bf16.msra.mxu0 %v398_v4 }
  0x35   :  { %355 = vmatprep.subr.bf16.mxu0 %v506_v0 }
  0x36   :  { %374 = vmatpush3.bf16.msra.mxu1 %v406_v14 }
  0x37   :  { %375 = vmatprep.subr.bf16.mxu1 %v506_v0 }
  0x38   :  { %356 = vmatpush3.bf16.msra.mxu0 %v399_v5 }
  0x39   :  { %357 = vmatprep.subr.bf16.mxu0 %v506_v0 }
  0x3a   :  { %376 = vmatpush3.bf16.msra.mxu1 %v407_v15 }
  0x3b   :  { %377 = vmatprep.subr.bf16.mxu1 %v506_v0 }
  0x3c   :  { %358 = vmatpush3.bf16.msra.mxu0 %v400_v6 }
  0x3d   :  { %359 = vmatprep.subr.bf16.mxu0 %v506_v0 }
  0x3e   :  { %378 = vmatpush3.bf16.msra.mxu1 %v408_v16 }
  0x3f   :  { %379 = vmatprep.subr.bf16.mxu1 %v506_v0 }
  0x40   :  { %360 = vmatpush3.bf16.msra.mxu0 %v401_v7 }
  0x41   :  { %361 = vmatprep.subr.bf16.mxu0 %v506_v0 }
  0x42   :  { %380 = vmatpush3.bf16.msra.mxu1 %v409_v17 }
  0x43   :  { %381 = vmatprep.subr.bf16.mxu1 %v506_v0 }
  0x44   :  { %362 = vmatpush3.bf16.msra.mxu0 %v402_v8 }
  0x46   :  { %382 = vmatpush3.bf16.msra.mxu1 %v410_v18 }
  0x47   :  { %364 = vmatmul.mubr.bf16.vlgmr.msra.gmra.mxu0 %v62_v10 }
 0x107   :  { %v168_v20 = vpop.f32.mrf.mxu0 }
 0x108   :  { %v169_v21 = vadd.f32 %v310_v19, %v168_v20 }
 0x109   :  { %v365_v22 = vpop.f32.mrf.mxu0 }
 0x10a   :  { %v319_v23 = vmul.f32 -1.442695, %v169_v21 }
 0x10b   :  { %v171_v24 = vpop.f32.mrf.mxu0 }
 0x10c   :  { %411 = vpow2.f32 %v319_v23 }
 0x10d   :  { %v366_v25 = vpop.f32.mrf.mxu0 }
 0x119   :  { %v412_v26 = vpop.eup %411 }
 0x11a   :  { %v177_v27 = vadd.f32 1.0, %v412_v26 }
 0x11c   :  { %413 = vrcp.f32 %v177_v27 }
 0x129   :  { %v414_v28 = vpop.eup %413 }
 0x12a   :  { %v180_v29 = vmul.f32 %v414_v28, %v169_v21 }
 0x12c   :  { %v181_v30 = vpack.c.bf16 %v180_v29, %v180_v29 }
 0x12e   :  { %384 = vmatmul.mubr.bf16.vlgmr.msra.gmra.mxu1 %v181_v30 }
 0x1ee   :  { %v287_v32 = vpop.f32.mrf.mxu1 }
 0x1ef   :  { %v288_v33 = vadd.f32 %v320_v31, %v287_v32 }
 0x1f0   :  { %v385_v34 = vpop.f32.mrf.mxu1 }
 0x1f1   :  { %293 = vst [vmem:[#allocation8] sm:$0xff] %v288_v33 }
 0x1f2   :  { %v290_v35 = vpop.f32.mrf.mxu1 }
 0x1f3   :  { %486 = shalt.err (!%p483_p5)
}
 0x1f4   :  { %303 = dma.vmem_to_hbm [thread:$0]  %s301_s2, 128, %s562_s5, [#allocation4]   ;;  %v386_v36 = vpop.f32.mrf.mxu1 }
 0x1f5   :  { %499 = dma.done.wait [#allocation4], 128  }
 0x1f6   :  { %500 = vsyncadd [#allocation4], 4294967168 }
 0x1f7   :  { %307 = vsyncpa [#allocation3], 1 }
 0x1f8   :  { %308 = vsyncpa [#allocation6], 1 }
 0x1f9   :  { %309 = vsyncpa [#allocation4], 1 }

</bundles_post_ra>
